<compile_context>
chip_gen: v7x
topology: tpu7x:2x2x1
jax: 0.10.0
libtpu: 0.0.40
codegen_flags: <defaults>
</compile_context>

<pallas_src>
import math
from functools import partial

import jax
import jax.numpy as jnp
from jax.experimental import pallas as pl
from jax.experimental.pallas import tpu as pltpu


def _round_up(x, m):
    return (x + m - 1) // m * m


def _patch_embed_kernel(x_ref, w_ref, b_ref, o_ref):
    # x_ref: (TM, K) bf16 patches, w_ref: (K, E) bf16, b_ref: (1, E) f32,
    # o_ref: (TM, E) f32.  f32 accumulation on the MXU, bias added in f32.
    acc = jnp.dot(x_ref[...], w_ref[...], preferred_element_type=jnp.float32)
    o_ref[...] = (acc + b_ref[...]).astype(o_ref.dtype)


def patch_embed_matmul(patches, w_flat_t, bias, *, tm=4096,
                       vmem_budget_bytes=12 * 1024 * 1024):
    """patches: (M, K), w_flat_t: (K, E), bias: (E,) -> (M, E) f32."""
    M, K = patches.shape
    _, E = w_flat_t.shape

    # bf16 streaming operands (memory-bound kernel); accumulation stays f32.
    patches_bf = patches.astype(jnp.bfloat16)
    w_bf = w_flat_t.astype(jnp.bfloat16)
    bias2d = bias.astype(jnp.float32).reshape(1, E)

    # Ensure >= 2 grid steps whenever M allows it so the "parallel" M axis
    # actually shards across both v7x TensorCores (no-op on v5e/v6e).
    tm = min(tm, _round_up(pl.cdiv(M, 2), 8))
    tm = max(tm, 8)

    # Cap the tile so the double-buffered footprint fits every generation's
    # default scoped VMEM (v5e: 16 MiB) without touching vmem_limit_bytes.
    def _footprint(t):
        return 2 * t * K * 2 + 2 * t * E * 4 + K * E * 2 + E * 4

    while tm > 8 and _footprint(tm) > vmem_budget_bytes:
        tm = max(8, _round_up(tm // 2, 8))

    grid = (pl.cdiv(M, tm),)

    # Bytes match the chosen layout: bf16 patch stream + bf16 weight + f32
    # bias read, unpadded f32 output write.
    cost = pl.CostEstimate(
        flops=2 * M * K * E,
        transcendentals=0,
        bytes_accessed=M * K * 2 + K * E * 2 + E * 4 + M * E * 4,
    )

    # TODO(synk): on v7x, pipeline_mode=pl.Buffered(3) on the patches spec is
    # a further knob if the DMA is still exposed at tm=4096.
    out = pl.pallas_call(
        _patch_embed_kernel,
        out_shape=jax.ShapeDtypeStruct((M, E), jnp.float32),
        grid_spec=pltpu.PrefetchScalarGridSpec(
            num_scalar_prefetch=0,
            grid=grid,
            in_specs=[
                pl.BlockSpec((tm, K), lambda i: (i, 0)),   # streamed patches
                pl.BlockSpec((K, E), lambda i: (0, 0)),    # resident weight
                pl.BlockSpec((1, E), lambda i: (0, 0)),    # resident bias
            ],
            out_specs=pl.BlockSpec((tm, E), lambda i: (i, 0)),  # unpadded store
        ),
        compiler_params=pltpu.CompilerParams(
            dimension_semantics=("parallel",),
            # Ask XLA to fuse the patch-extraction transpose / bf16 cast into
            # the kernel's input DMA (avoids materializing `patches` in HBM).
            allow_input_fusion=[True, False, False],
        ),
        cost_estimate=cost,
    )(patches_bf, w_bf, bias2d)
    return out


@partial(jax.jit,
         static_argnames=("ph", "pw", "pad_h", "pad_w", "tm", "use_pallas"))
def _patch_embed_forward(x, weight, bias, *, ph, pw, pad_h=0, pad_w=0,
                         tm=4096, use_pallas=None):
    B, C, H, W = x.shape
    E = weight.shape[0]

    if pad_h or pad_w:
        x = jnp.pad(x, ((0, 0), (0, 0), (pad_h, pad_h), (pad_w, pad_w)))
        H, W = H + 2 * pad_h, W + 2 * pad_w

    # Conv with stride == kernel drops any remainder rows/cols.
    Hp, Wp = H // ph, W // pw
    x = x[:, :, : Hp * ph, : Wp * pw]

    M = B * Hp * Wp
    K = C * ph * pw
    w_flat_t = weight.reshape(E, K).T  # (K, E), matches Conv2d OIHW flattening

    if use_pallas is None:
        # Small-M fallback: launch/per-step overhead dominates; a plain XLA
        # dot fuses with the transpose and bias add.
        use_pallas = M >= 2048

    if not use_pallas:
        xp = x.reshape(B, C, Hp, ph, Wp, pw)
        xp = jnp.transpose(xp, (0, 2, 4, 1, 3, 5)).reshape(M, K)
        out = jnp.dot(xp, w_flat_t) + bias
        return out.reshape(B, Hp, Wp, E)

    # bf16 cast BEFORE the transpose: worst case only a bf16 patches array is
    # materialized; best case XLA fuses the whole thing into the input DMA.
    xp = x.astype(jnp.bfloat16).reshape(B, C, Hp, ph, Wp, pw)
    xp = jnp.transpose(xp, (0, 2, 4, 1, 3, 5))          # (B, Hp, Wp, C, ph, pw)
    patches = xp.reshape(M, K)

    out = patch_embed_matmul(patches, w_flat_t, bias, tm=tm)  # (M, E) f32
    return out.reshape(B, Hp, Wp, E)                          # == permute(0,2,3,1)


class PatchEmbed:
    """JAX/Pallas equivalent of the PyTorch PatchEmbed module.

    Note: patches and weights are streamed to the MXU in bf16 (f32
    accumulation); results match an f32 Conv2d to ~1e-3.
    """

    def __init__(self, kernel_size=(16, 16), stride=(16, 16), padding=(0, 0),
                 in_chans=3, embed_dim=768, key=None):
        # TODO(synk): stride != kernel_size (overlapping patches) has no clean
        # patch-matmul form; ViT patch embed always uses kernel_size == stride.
        assert kernel_size == stride, "patch embedding uses kernel_size == stride"
        self.kernel_size = kernel_size
        self.stride = stride
        self.padding = padding
        self.in_chans = in_chans
        self.embed_dim = embed_dim

        if key is None:
            key = jax.random.PRNGKey(0)
        kw, kb = jax.random.split(key)
        ph, pw = kernel_size
        fan_in = in_chans * ph * pw
        bound = 1.0 / math.sqrt(fan_in)
        # Conv2d weight: (E, C, ph, pw), bias: (E,)  (uniform init like PyTorch)
        self.weight = jax.random.uniform(
            kw, (embed_dim, in_chans, ph, pw), jnp.float32, -bound, bound)
        self.bias = jax.random.uniform(
            kb, (embed_dim,), jnp.float32, -bound, bound)

    def __call__(self, x, *, use_pallas=None):
        B, C, H, W = x.shape
        assert C == self.in_chans
        ph, pw = self.kernel_size
        return _patch_embed_forward(
            x, self.weight, self.bias, ph=ph, pw=pw,
            pad_h=self.padding[0], pad_w=self.padding[1],
            use_pallas=use_pallas)


def _reference(x, weight, bias, stride, padding=(0, 0)):
    # Pure-JAX conv reference for correctness checking.
    y = jax.lax.conv_general_dilated(
        x, weight, window_strides=stride,
        padding=[(padding[0], padding[0]), (padding[1], padding[1])],
        dimension_numbers=("NCHW", "OIHW", "NCHW"))
    y = y + bias.reshape(1, -1, 1, 1)
    return jnp.transpose(y, (0, 2, 3, 1))


if __name__ == "__main__":
    key = jax.random.PRNGKey(0)
    kx, kp = jax.random.split(key)

    B, C, H, W = 2, 4, 16, 16
    x = jax.random.normal(kx, (B, C, H, W), jnp.float32)

    mod = PatchEmbed(kernel_size=(8, 8), stride=(8, 8), padding=(0, 0),
                     in_chans=C, embed_dim=32, key=kp)

    # Force the Pallas path so the kernel is exercised (M=8 here would
    # normally take the small-M XLA fallback).
    out = jax.block_until_ready(mod(x, use_pallas=True))

    # Reference conv on bf16-rounded operands (kernel streams bf16, accumulates f32).
    ref_bf16 = _reference(
        x.astype(jnp.bfloat16).astype(jnp.float32),
        mod.weight.astype(jnp.bfloat16).astype(jnp.float32),
        mod.bias, mod.stride)

    assert out.shape == (B, H // 8, W // 8, 32), out.shape
    assert out.dtype == jnp.float32, out.dtype
    max_err = float(jnp.max(jnp.abs(out - ref_bf16)))
    assert jnp.allclose(out, ref_bf16, atol=2e-3, rtol=2e-3), f"mismatch: {max_err}"

    # Default (auto) path on tiny M takes the f32 XLA fallback; check it too.
    out_auto = jax.block_until_ready(mod(x))
    ref_f32 = _reference(x, mod.weight, mod.bias, mod.stride)
    max_err_auto = float(jnp.max(jnp.abs(out_auto - ref_f32)))
    assert jnp.allclose(out_auto, ref_f32, atol=2e-3, rtol=2e-3), \
        f"fallback mismatch: {max_err_auto}"

    print("KERNEL_OK")
</pallas_src>

<mosaic_0001>
module attributes {stable_mosaic.version = 11 : i64} {
  func.func @_patch_embed_kernel(%arg0: i32, %arg1: memref<8x256xbf16, #tpu.memory_space<vmem>>, %arg2: memref<256x32xbf16, #tpu.memory_space<vmem>>, %arg3: memref<1x32xf32, #tpu.memory_space<vmem>>, %arg4: memref<8x32xf32, #tpu.memory_space<vmem>>) attributes {dimension_semantics = [#tpu.dimension_semantics<parallel>], iteration_bounds = array<i64: 1>, scalar_prefetch = 0 : i64, scratch_operands = 0 : i64, tpu.core_type = #tpu.core_type<tc>, window_params = [{transform_indices = @transform_0, window_bounds = array<i64: 8, 256>}, {pipeline_mode = #tpu.pipeline_mode<synchronous>, transform_indices = @transform_1, window_bounds = array<i64: 256, 32>}, {pipeline_mode = #tpu.pipeline_mode<synchronous>, transform_indices = @transform_2, window_bounds = array<i64: 1, 32>}, {transform_indices = @transform_3, window_bounds = array<i64: 8, 32>}]} {
    %c0 = arith.constant 0 : index
    %c0_0 = arith.constant 0 : index
    %0 = vector.load %arg1[%c0, %c0_0] : memref<8x256xbf16, #tpu.memory_space<vmem>>, vector<8x256xbf16>
    %c0_1 = arith.constant 0 : index
    %c0_2 = arith.constant 0 : index
    %1 = vector.load %arg2[%c0_1, %c0_2] : memref<256x32xbf16, #tpu.memory_space<vmem>>, vector<256x32xbf16>
    %cst = arith.constant dense<0.000000e+00> : vector<8x32xf32>
    %2 = tpu.matmul %0, %1, %cst {dimension_numbers = #tpu.dot_dimension_numbers<[1], [0], [0], [1], [0, 0, 1, 1], [], []>} : vector<8x256xbf16>, vector<256x32xbf16>, vector<8x32xf32> -> vector<8x32xf32>
    %c0_3 = arith.constant 0 : index
    %c0_4 = arith.constant 0 : index
    %3 = vector.load %arg3[%c0_3, %c0_4] : memref<1x32xf32, #tpu.memory_space<vmem>>, vector<1x32xf32>
    %4 = vector.broadcast %3 : vector<1x32xf32> to vector<8x32xf32>
    %5 = arith.addf %2, %4 : vector<8x32xf32>
    %c0_5 = arith.constant 0 : index
    %c0_6 = arith.constant 0 : index
    %6 = vector.load %arg4[%c0_5, %c0_6] : memref<8x32xf32, #tpu.memory_space<vmem>>, vector<8x32xf32>
    tpu.vector_store %arg4[%c0_5, %c0_6], %5 {strides = array<i32>} : memref<8x32xf32, #tpu.memory_space<vmem>>, vector<8x32xf32>,
    return
  }
  func.func @transform_0(%arg0: i32) -> (i32, i32) {
    %c0_i32 = arith.constant 0 : i32
    %c0_i32_0 = arith.constant 0 : i32
    return %arg0, %c0_i32 : i32, i32
  }
  func.func @transform_1(%arg0: i32) -> (i32, i32) {
    %c0_i32 = arith.constant 0 : i32
    %c0_i32_0 = arith.constant 0 : i32
    %c0_i32_1 = arith.constant 0 : i32
    return %c0_i32, %c0_i32_0 : i32, i32
  }
  func.func @transform_2(%arg0: i32) -> (i32, i32) {
    %c0_i32 = arith.constant 0 : i32
    %c0_i32_0 = arith.constant 0 : i32
    %c0_i32_1 = arith.constant 0 : i32
    return %c0_i32, %c0_i32_0 : i32, i32
  }
  func.func @transform_3(%arg0: i32) -> (i32, i32) {
    %c0_i32 = arith.constant 0 : i32
    %c0_i32_0 = arith.constant 0 : i32
    return %arg0, %c0_i32 : i32, i32
  }
}

</mosaic_0001>

<bundles_post_ra>
// kernel: _patch_embed_forward.1
= control target key start
LH: loop header
LB: loop body
LE: loop exit
PB: predicated region body
PF: predicated region fallthrough
CT: control target
= control target key end

     0   :  { %s386_s0 = inlined_call_operand.vmem [shape: bf16[8,256], index: 0, kind: input, shape index: {}]   ;;  %s387_s1 = inlined_call_operand.vmem [shape: bf16[256,32], index: 1, kind: input, shape index: {}]   ;;  %s388_s2 = inlined_call_operand.vmem [shape: f32[1,32], index: 2, kind: input, shape index: {}]   ;;  %s389_s3 = inlined_call_operand.hbm [shape: f32[8,32], index: 3, kind: output, shape index: {}]  }
   0x1   :  { %v257_v0 = vld [vmem:[%s387_s1 + $0x40] sm:$0xff]   ;;  %v259_v2 = vld [vmem:[%s387_s1 + $0x48] sm:$0xff]   ;;  %v261_v4 = vld [vmem:[%s387_s1 + $0x50] sm:$0xff]  }
   0x2   :  { %v258_v1 = vld [vmem:[%s387_s1] sm:$0xff]   ;;  %234 = vmatprep.subr.bf16.mxu0 %v257_v0  ;;  %v260_v3 = vld [vmem:[%s387_s1 + $0x8] sm:$0xff]   ;;  %v262_v5 = vld [vmem:[%s387_s1 + $0x10] sm:$0xff]  }
   0x3   :  { %235 = vmatpush3.bf16.msra.mxu0 %v258_v1  ;;  %v263_v6 = vld [vmem:[%s387_s1 + $0x58] sm:$0xff]   ;;  %v265_v8 = vld [vmem:[%s387_s1 + $0x60] sm:$0xff]   ;;  %v267_v10 = vld [vmem:[%s387_s1 + $0x68] sm:$0xff]  }
   0x4   :  { %236 = vmatprep.subr.bf16.mxu0 %v259_v2  ;;  %v264_v7 = vld [vmem:[%s387_s1 + $0x18] sm:$0xff]   ;;  %v266_v9 = vld [vmem:[%s387_s1 + $0x20] sm:$0xff]  }
   0x5   :  { %v16_v11 = vld [vmem:[%s386_s0] sm:$0xff] }
   0x7   :  { %237 = vmatpush3.bf16.msra.mxu0 %v260_v3 }
   0x8   :  { %238 = vmatprep.subr.bf16.mxu0 %v261_v4 }
   0xb   :  { %239 = vmatpush3.bf16.msra.mxu0 %v262_v5 }
   0xc   :  { %240 = vmatprep.subr.bf16.mxu0 %v263_v6 }
   0xf   :  { %241 = vmatpush3.bf16.msra.mxu0 %v264_v7 }
  0x10   :  { %242 = vmatprep.subr.bf16.mxu0 %v265_v8 }
  0x11   :  { %8 = vsyncpa [#allocation3], 0  ;;  %v217_v12 = vcombine.high %v16_v11, %v16_v11  ;;  %v268_v13 = vld [vmem:[%s387_s1 + $0x28] sm:$0xff]   ;;  %v269_v14 = vld [vmem:[%s387_s1 + $0x70] sm:$0xff]   ;;  %v216_v18 = vcombine.low %v16_v11, %v16_v11  ;;  %s299_s20 = smov [#allocation2]   ;;  %vm199_vm0 = vcmask 261120  }
  0x12   :  { %v270_v15 = vld [vmem:[%s387_s1 + $0x30] sm:$0xff]   ;;  %v271_v16 = vld [vmem:[%s387_s1 + $0x78] sm:$0xff]   ;;  %v215_v20 = vld [vmem:[%s388_s2] ss:$0 sm:$0xff]  ;;  %s207_s21 = sshll.u32 %s299_s20, 4  ;;  %s208_s21 = int_to_ptr.vmem [resolvable:$true] %s207_s21 }
  0x13   :  { %243 = vmatpush3.bf16.msra.mxu0 %v266_v9  ;;  %191 = vmatprep.mubr.bf16.mxu0 %v217_v12  ;;  %v272_v17 = vld [vmem:[%s387_s1 + $0x38] sm:$0xff]   ;;  %s275_s1 = scalar_lea.vmem %s208_s21, 128  ;;  %p280_p1 = scmp.lt.s32.totalorder %s208_s21, %s208_s21 }
  0x14   :  { %244 = vmatprep.subr.bf16.mxu0 %v267_v10  ;;  %p276_p0 = scmp.ne.s32.totalorder %s208_s21, %s275_s1  ;;  %p281_p2 = scmp.lt.s32.totalorder %s275_s1, %s275_s1 }
  0x16   :  { %p282_p3 = por %p281_p2, %p280_p1 }
  0x17   :  { %245 = vmatpush3.bf16.msra.mxu0 %v268_v13 }
  0x18   :  { %246 = vmatprep.subr.bf16.mxu0 %v269_v14  ;;  %p283_p4 = pnand %p282_p3, %p276_p0 }
  0x1b   :  { %247 = vmatpush3.bf16.msra.mxu0 %v270_v15 }
  0x1c   :  { %248 = vmatprep.subr.bf16.mxu0 %v271_v16 }
  0x1f   :  { %249 = vmatpush3.bf16.msra.mxu0 %v272_v17 }
  0x22   :  { %192 = vmatmul.mubr.bf16.vlgmr.msra.gmra.mrb[0].mxu0 %v216_v18 }
  0xf5   :  { %v250_v19 = vpop.f32.mrb[0].mxu0 }
  0xf6   :  { %v251_v21 = vpop.f32.mrb[1].mxu0 }
  0xf7   :  { %v252_v22 = vadd.f32 %v251_v21, %v250_v19  ;;  %v253_v23 = vpop.f32.mrb[2].mxu0 }
  0xf8   :  { %v254_v24 = vpop.f32.mrb[3].mxu0 }
  0xf9   :  { %v194_v25 = vadd.f32 %v252_v22, %v215_v20 }
  0xfb   :  { %200 = vst.msk [vmem:[#allocation2] sm:$0xff] %vm199_vm0, %v194_v25 }
  0xfc   :  { %286 = shalt.err (!%p283_p4)
}
  0xfd   :  { %s287_s2 = scalar_lea.hbm %s389_s3, 128 }
  0xfe   :  { %p288_p5 = scmp.ne.s32.totalorder %s389_s3, %s287_s2  ;;  %p291_p6 = scmp.lt.u32.totalorder %s287_s2, %s389_s3 }
 0x100   :  { %p293_p7 = pnand %p291_p6, %p288_p5 }
 0x102   :  { %296 = shalt.err (!%p293_p7)
}
 0x103   :  { %210 = dma.vmem_to_hbm [thread:$0]  %s208_s21, 128, %s389_s3, [#allocation3]  }
 0x104   :  { %297 = dma.done.wait [#allocation3], 128  }
 0x105   :  { %298 = vsyncadd [#allocation3], 4294967168 }
 0x106   :  { %214 = vsyncpa [#allocation3], 1 }

</bundles_post_ra>
